<compile_context>
chip_gen: v7x
topology: tpu7x:2x2x1
jax: 0.10.0
libtpu: 0.0.40
codegen_flags: <defaults>
</compile_context>

<pallas_src>
import jax
import jax.numpy as jnp
from jax.experimental import pallas as pl
from jax.experimental.pallas import tpu as pltpu


def _hw_budgets():
    """(target_block_bytes, vmem_limit_bytes), derived from the chip's VMEM."""
    vmem_cap = 64 * 1024 * 1024  # conservative fallback (v7x per-TC VMEM)
    try:
        info = pltpu.get_tpu_info()
        cap = getattr(info, "vmem_capacity_bytes", None)
        if cap:
            vmem_cap = int(cap)
    except Exception:
        pass
    if vmem_cap >= 96 * 1024 * 1024:          # v5e / v6e class (128 MiB VMEM)
        return 16 * 1024 * 1024, 96 * 1024 * 1024
    # v7x class (64 MiB per-TC) or unknown: 4 x 8 MiB double-buffered = 32 MiB.
    return 8 * 1024 * 1024, 48 * 1024 * 1024


def _row_tile(num_rows, itemsize, target_bytes):
    """Largest sublane-dense row tile (dtype packing aware) within the budget."""
    sub = 8 * max(1, 4 // itemsize)           # 8 f32 / 16 bf16 / 32 int8-fp8
    max_rows = max(sub, (target_bytes // (128 * itemsize)) // sub * sub)
    if num_rows <= max_rows:
        return num_rows                       # full extent (block dim == array dim)
    return max_rows                           # multiple of packing; tail is masked


def _col_tile(num_cols, num_rows, itemsize, target_bytes):
    """Largest 128-multiple column tile within the budget (ragged-F path)."""
    max_cols = max(128, (target_bytes // (num_rows * itemsize)) // 128 * 128)
    if num_cols <= max_cols:
        return num_cols                       # full extent (block dim == array dim)
    return max_cols                           # multiple of 128; tail is masked


def _scale_mul_kernel(x_ref, s_ref, o_ref):
    # x_ref: (rows, cols) tile; s_ref: (rows, 1) per-row scale in x's dtype.
    # Broadcast along lanes; compute stays in native dtype.
    o_ref[...] = x_ref[...] * s_ref[...]


def drop_path(x, p, key, training=True):
    """Pallas DropPath. x: (B, ...) — drop decision is per sample."""
    assert 0.0 <= p <= 1.0
    if (not training) or p == 0.0:
        return x
    if p == 1.0:
        # keep_prob == 0 -> every sample dropped; avoid inf scale.
        return jnp.zeros_like(x)

    B = x.shape[0]
    F = 1
    for d in x.shape[1:]:
        F *= d
    keep_prob = 1.0 - p
    itemsize = x.dtype.itemsize

    # Per-sample uniform draw (mirrors torch.rand(batch, 1, 1, 1)), folded into
    # a single per-sample scale factor (0 or 1/keep_prob).
    rand = jax.random.uniform(key, (B,), dtype=jnp.float32)
    scale = jnp.where(rand > keep_prob, 0.0, 1.0 / keep_prob)     # f32, (B,)

    target_block, vmem_limit = _hw_budgets()
    x2 = x.reshape(B, F)

    if F % 128 == 0:
        # Lane- and sublane-dense repack: (B*R, 128).  Pure reshape, no copy.
        R = F // 128
        rows = B * R
        xr = x2.reshape(rows, 128)
        s_rows = jnp.repeat(scale, R).reshape(rows, 1).astype(x.dtype)

        S = _row_tile(rows, itemsize, target_block)
        grid = (pl.cdiv(rows, S),)            # one flat parallel axis (megacore)

        out = pl.pallas_call(
            _scale_mul_kernel,
            out_shape=jax.ShapeDtypeStruct((rows, 128), x.dtype),
            grid_spec=pltpu.PrefetchScalarGridSpec(
                num_scalar_prefetch=0,
                grid=grid,
                in_specs=[
                    pl.BlockSpec((S, 128), lambda i: (i, 0)),
                    pl.BlockSpec((S, 1), lambda i: (i, 0)),
                ],
                out_specs=pl.BlockSpec((S, 128), lambda i: (i, 0)),
            ),
            compiler_params=pltpu.CompilerParams(
                dimension_semantics=("parallel",),
                vmem_limit_bytes=vmem_limit,
            ),
            cost_estimate=pl.CostEstimate(
                flops=B * F,
                transcendentals=0,
                bytes_accessed=2 * B * F * itemsize + rows * itemsize,
            ),
        )(xr, s_rows)
        return out.reshape(x.shape)

    # Ragged F (F % 128 != 0): run directly on the (B, F) view.  No materialized
    # pad / slice passes; the last F tile is a masked partial block.
    s_col = scale.reshape(B, 1).astype(x.dtype)
    Tf = _col_tile(F, B, itemsize, target_block)
    grid = (pl.cdiv(F, Tf),)

    out = pl.pallas_call(
        _scale_mul_kernel,
        out_shape=jax.ShapeDtypeStruct((B, F), x.dtype),
        grid_spec=pltpu.PrefetchScalarGridSpec(
            num_scalar_prefetch=0,
            grid=grid,
            in_specs=[
                pl.BlockSpec((B, Tf), lambda j: (0, j)),
                pl.BlockSpec((B, 1), lambda j: (0, 0)),   # same block -> DMA'd once
            ],
            out_specs=pl.BlockSpec((B, Tf), lambda j: (0, j)),
        ),
        compiler_params=pltpu.CompilerParams(
            dimension_semantics=("parallel",),
            vmem_limit_bytes=vmem_limit,
        ),
        cost_estimate=pl.CostEstimate(
            flops=B * F,
            transcendentals=0,
            bytes_accessed=2 * B * F * itemsize + B * itemsize,
        ),
    )(x2, s_col)
    return out.reshape(x.shape)


if __name__ == "__main__":
    key = jax.random.PRNGKey(0)
    kx, kd = jax.random.split(key)

    B, C, H, W = 2, 4, 16, 16
    x = jax.random.normal(kx, (B, C, H, W), dtype=jnp.float32)
    p = 0.2
    keep_prob = 1.0 - p

    # Pallas kernel (training mode), 128-aligned feature path.
    y = jax.block_until_ready(drop_path(x, p, kd, training=True))

    # Pure-JAX reference with the same random draw.
    rand = jax.random.uniform(kd, (B,), dtype=jnp.float32)
    drop = (rand > keep_prob).reshape(B, 1, 1, 1)
    y_ref = jnp.where(drop, 0.0, x / keep_prob)
    assert jnp.allclose(y, y_ref, atol=1e-6, rtol=1e-6), "mismatch vs reference"

    # Eval mode is identity.
    y_eval = drop_path(x, p, kd, training=False)
    assert jnp.array_equal(y_eval, x)

    # p == 1.0 drops everything (guarded against inf scale).
    y_full = jax.block_until_ready(drop_path(x, 1.0, kd, training=True))
    assert jnp.array_equal(y_full, jnp.zeros_like(x))

    # Feature size not divisible by 128: ragged path (no pad / slice passes).
    x_odd = jax.random.normal(kx, (2, 3, 5, 7), dtype=jnp.float32)
    y_odd = jax.block_until_ready(drop_path(x_odd, p, kd, training=True))
    rand_odd = jax.random.uniform(kd, (2,), dtype=jnp.float32)
    drop_odd = (rand_odd > keep_prob).reshape(2, 1, 1, 1)
    y_odd_ref = jnp.where(drop_odd, 0.0, x_odd / keep_prob)
    assert jnp.allclose(y_odd, y_odd_ref, atol=1e-6, rtol=1e-6), "mismatch (odd shape)"

    # bf16 input exercises the dtype-aware (packed-sublane) tiling.
    x_bf = x.astype(jnp.bfloat16)
    y_bf = jax.block_until_ready(drop_path(x_bf, p, kd, training=True))
    y_bf_ref = jnp.where(drop, 0.0, x_bf.astype(jnp.float32) / keep_prob).astype(jnp.bfloat16)
    assert jnp.allclose(y_bf.astype(jnp.float32), y_bf_ref.astype(jnp.float32),
                        atol=2e-2, rtol=2e-2), "mismatch (bf16)"

    print("KERNEL_OK")
</pallas_src>

<mosaic_0001>
module attributes {stable_mosaic.version = 11 : i64} {
  func.func @_scale_mul_kernel(%arg0: i32, %arg1: memref<16x128xf32, #tpu.memory_space<vmem>>, %arg2: memref<16x1xf32, #tpu.memory_space<vmem>>, %arg3: memref<16x128xf32, #tpu.memory_space<vmem>>) attributes {dimension_semantics = [#tpu.dimension_semantics<parallel>], iteration_bounds = array<i64: 1>, scalar_prefetch = 0 : i64, scratch_operands = 0 : i64, tpu.core_type = #tpu.core_type<tc>, window_params = [{transform_indices = @transform_0, window_bounds = array<i64: 16, 128>}, {transform_indices = @transform_1, window_bounds = array<i64: 16, 1>}, {transform_indices = @transform_2, window_bounds = array<i64: 16, 128>}]} {
    %c0 = arith.constant 0 : index
    %c0_0 = arith.constant 0 : index
    %0 = vector.load %arg1[%c0, %c0_0] : memref<16x128xf32, #tpu.memory_space<vmem>>, vector<16x128xf32>
    %c0_1 = arith.constant 0 : index
    %c0_2 = arith.constant 0 : index
    %1 = vector.load %arg2[%c0_1, %c0_2] : memref<16x1xf32, #tpu.memory_space<vmem>>, vector<16x1xf32>
    %2 = vector.broadcast %1 : vector<16x1xf32> to vector<16x128xf32>
    %3 = arith.mulf %0, %2 : vector<16x128xf32>
    %c0_3 = arith.constant 0 : index
    %c0_4 = arith.constant 0 : index
    %4 = vector.load %arg3[%c0_3, %c0_4] : memref<16x128xf32, #tpu.memory_space<vmem>>, vector<16x128xf32>
    tpu.vector_store %arg3[%c0_3, %c0_4], %3 {strides = array<i32>} : memref<16x128xf32, #tpu.memory_space<vmem>>, vector<16x128xf32>,
    return
  }
  func.func @transform_0(%arg0: i32) -> (i32, i32) {
    %c0_i32 = arith.constant 0 : i32
    %c0_i32_0 = arith.constant 0 : i32
    return %arg0, %c0_i32 : i32, i32
  }
  func.func @transform_1(%arg0: i32) -> (i32, i32) {
    %c0_i32 = arith.constant 0 : i32
    %c0_i32_0 = arith.constant 0 : i32
    return %arg0, %c0_i32 : i32, i32
  }
  func.func @transform_2(%arg0: i32) -> (i32, i32) {
    %c0_i32 = arith.constant 0 : i32
    %c0_i32_0 = arith.constant 0 : i32
    return %arg0, %c0_i32 : i32, i32
  }
}

</mosaic_0001>

<bundles_post_ra>
// kernel: tpu_custom_call.1
= control target key start
LH: loop header
LB: loop body
LE: loop exit
PB: predicated region body
PF: predicated region fallthrough
CT: control target
= control target key end

     0   :  { %s118_s0 = inlined_call_operand.vmem [shape: f32[16,128], index: 0, kind: input, shape index: {}]   ;;  %s119_s1 = inlined_call_operand.vmem [shape: f32[16,1], index: 1, kind: input, shape index: {}]   ;;  %s120_s2 = inlined_call_operand.hbm [shape: f32[16,128], index: 2, kind: output, shape index: {}]  }
   0x1   :  { %v14_v0 = vld [vmem:[%s119_s1] sm:$0xff] }
   0x2   :  { %7 = vsyncpa [#allocation3], 0  ;;  %v75_v1 = vmov 0   ;;  %v15_v2 = vld [vmem:[%s119_s1 + $0x8] sm:$0xff]  ;;  %v12_v3 = vld [vmem:[%s118_s0] sm:$0xff]  ;;  %s76_s15 = smov [#allocation2]  }
   0x3   :  { %50 = vset.pattern.permute.xlu0 %v75_v1  ;;  %s35_s16 = sshll.u32 %s76_s15, 4  ;;  %v13_v6 = vld [vmem:[%s118_s0 + $0x8] sm:$0xff]  ;;  %s36_s16 = int_to_ptr.vmem [resolvable:$true] %s35_s16 }
   0x4   :  { %18 = vperm.xlu0 %50, %v14_v0   ;;  %s51_s19 = scalar_lea.vmem %s36_s16, 256  ;;  %p56_p1 = scmp.lt.s32.totalorder %s36_s16, %s36_s16 }
   0x5   :  { %p52_p0 = scmp.ne.s32.totalorder %s36_s16, %s51_s19  ;;  %p57_p2 = scmp.lt.s32.totalorder %s51_s19, %s51_s19 }
   0x7   :  { %p58_p3 = por %p57_p2, %p56_p1 }
   0x8   :  { %23 = vperm.xlu0 %50, %v15_v2  }
   0x9   :  { %p59_p4 = pnand %p58_p3, %p52_p0 }
  0x83   :  { %v19_v4 = vpop.permute.xlu0 %18 }
  0x84   :  { %v26_v5 = vmul.f32 %v19_v4, %v12_v3 }
  0x86   :  { %28 = vst [vmem:[#allocation2] sm:$0xff] %v26_v5 }
  0x87   :  { %v24_v7 = vpop.permute.xlu0 %23 }
  0x88   :  { %v27_v8 = vmul.f32 %v24_v7, %v13_v6 }
  0x8a   :  { %29 = vst [vmem:[#allocation2 + $0x8] sm:$0xff] %v27_v8 }
  0x8b   :  { %62 = shalt.err (!%p59_p4)
}
  0x8c   :  { %s63_s21 = scalar_lea.hbm %s120_s2, 256 }
  0x8d   :  { %p64_p5 = scmp.ne.s32.totalorder %s120_s2, %s63_s21  ;;  %p67_p6 = scmp.lt.u32.totalorder %s63_s21, %s120_s2 }
  0x8f   :  { %p69_p7 = pnand %p67_p6, %p64_p5 }
  0x91   :  { %72 = shalt.err (!%p69_p7)
}
  0x92   :  { %s77_s25 = smov 128   ;;  %s78_s26 = smov 8  }
  0x93   :  { %41 = dma.vmem_to_hbm [thread:$0]  %s36_s16, 256, %s120_s2, [#allocation3], %s77_s25, %s77_s25, %s78_s26  }
  0x94   :  { %73 = dma.done.wait [#allocation3], 256  }
  0x95   :  { %74 = vsyncadd [#allocation3], 4294967040 }
  0x96   :  { %45 = vsyncpa [#allocation3], 1 }

</bundles_post_ra>
